<compile_context>
chip_gen: v7x
topology: tpu7x:2x2x1
jax: 0.10.0
libtpu: 0.0.40
codegen_flags: <defaults>
</compile_context>

<pallas_src>
import functools

import jax
import jax.numpy as jnp
from jax.experimental import pallas as pl
from jax.experimental.pallas import tpu as pltpu


def _round_up(n, m):
    return ((n + m - 1) // m) * m


def _sigmoid(x):
    # sigmoid(x) == 0.5 * tanh(x/2) + 0.5  -> one EUP push instead of two.
    return 0.5 * jnp.tanh(0.5 * x) + 0.5


def _pick_batch_tile(B):
    candidates = (1024, 512, 256, 128, 64, 32, 16, 8)
    bt = next((t for t in candidates if B % t == 0), B)
    # v7x: keep >= 2 grid steps on the (parallel) batch axis when the batch is
    # big enough to split, so both TensorCores get work. Harmless on v5e/v6e.
    if B >= 16 and bt >= B:
        bt = next((t for t in candidates if t <= B // 2 and B % t == 0), bt)
    return bt


def _pick_gate_chunk(Hp, k_rows, itemsize, budget_bytes=8 << 20):
    """Largest 128-multiple chunk Hc of the padded hidden dim whose
    gate-interleaved weight slab [Wx_j; Wh_j; b_j] (4*Hc wide) fits budget."""
    for hc in sorted({Hp, 2048, 1024, 512, 256, 128}, reverse=True):
        if hc <= Hp and Hp % hc == 0 and 4 * hc * (k_rows + 1) * itemsize <= budget_bytes:
            return hc
    return 128


def _lstm_cell_kernel(x_ref, h_ref, c_ref, wx_ref, wh_ref, b_ref, ht_ref, ct_ref):
    """One (batch-tile, gate-chunk) grid step.

    x_ref:(bt,I), h_ref:(bt,H)  activations (original dtype, cast in-kernel)
    c_ref:(bt,Hc)               previous cell state chunk (f32)
    wx_ref:(I,4Hc), wh_ref:(H,4Hc)  gate-interleaved weights [i|f|c~|o]
    b_ref:(1,4Hc)               bias row (f32)
    ht_ref, ct_ref:(bt,Hc)      f32 outputs
    """
    Hc = ct_ref.shape[-1]
    wdt = wx_ref.dtype

    # Two MXU dots with f32 accumulation; bias is one broadcast VPU add.
    gates = jnp.dot(x_ref[...].astype(wdt), wx_ref[...],
                    preferred_element_type=jnp.float32)
    gates = gates + jnp.dot(h_ref[...].astype(wdt), wh_ref[...],
                            preferred_element_type=jnp.float32)
    gates = gates + b_ref[...]

    it = _sigmoid(gates[:, 0 * Hc:1 * Hc])
    ft = _sigmoid(gates[:, 1 * Hc:2 * Hc])
    ct_tilde = jnp.tanh(gates[:, 2 * Hc:3 * Hc])
    ot = _sigmoid(gates[:, 3 * Hc:4 * Hc])

    # Elementwise state update strictly in f32; direct lane-dense stores.
    ct = ct_tilde * it + c_ref[...] * ft
    ht_ref[...] = (ot * jnp.tanh(ct)).astype(ht_ref.dtype)
    ct_ref[...] = ct.astype(ct_ref.dtype)


def prepare_lstm_weights(params, mxu_dtype=jnp.bfloat16):
    """One-time packing of the 8 nn.Linear parameters.

    Returns (wx, wh, b, gate_chunk) with
      wx:(I, Nc*4*Hc), wh:(H, Nc*4*Hc) in `mxu_dtype`, b:(1, Nc*4*Hc) f32,
    where H is zero-padded to Hp (multiple of 128) and columns are
    gate-interleaved per Hc-chunk: [i_j | f_j | c~_j | o_j].
    PyTorch nn.Linear stores weight as (out, in); we transpose to (in, out).
    """
    H, I = params["w_i_xx"].shape
    Hp = max(_round_up(H, 128), 128)
    Hc = _pick_gate_chunk(Hp, I + H, jnp.dtype(mxu_dtype).itemsize)
    Nc = Hp // Hc

    def pad_cols(w):  # (K, H) -> (K, Hp)
        return jnp.pad(w, ((0, 0), (0, Hp - H)))

    wx = jnp.stack([pad_cols(params[f"w_{g}_xx"].T) for g in "ifco"], axis=1)
    wh = jnp.stack([pad_cols(params[f"w_{g}_hh"].T) for g in "ifco"], axis=1)
    b = jnp.stack([jnp.pad(params[f"b_{g}_xx"], (0, Hp - H)) for g in "ifco"])

    def interleave(w):  # (K, 4, Hp) -> (K, Nc*4*Hc), chunk-major gate blocks
        K = w.shape[0]
        return (w.reshape(K, 4, Nc, Hc).transpose(0, 2, 1, 3)
                .reshape(K, Nc * 4 * Hc))

    wx = interleave(wx).astype(mxu_dtype)
    wh = interleave(wh).astype(mxu_dtype)
    b = (b.reshape(4, Nc, Hc).transpose(1, 0, 2)
         .reshape(1, Nc * 4 * Hc).astype(jnp.float32))
    return wx, wh, b, Hc


@functools.partial(jax.jit, static_argnames=("gate_chunk",))
def lstm_cell(x, h, c, wx, wh, b, *, gate_chunk):
    """One LSTM-cell step (matches MyLSTMCell.forward). Returns (ht, ct) f32."""
    B, I = x.shape
    H = h.shape[1]
    Hc = gate_chunk
    Hp = b.shape[1] // 4
    Nc = Hp // Hc
    assert wx.shape == (I, Nc * 4 * Hc) and wh.shape == (H, Nc * 4 * Hc)

    # Cell state stays f32 regardless of activation dtype; pad once to the
    # lane-aligned Hp (a no-op when H % 128 == 0, i.e. production sizes).
    c32 = c.astype(jnp.float32)
    c_pad = jnp.pad(c32, ((0, 0), (0, Hp - H))) if Hp != H else c32

    bt = _pick_batch_tile(B)
    grid = (B // bt, Nc)

    w_itm = jnp.dtype(wx.dtype).itemsize
    w_chunk = (I + H) * 4 * Hc * w_itm + 4 * Hc * 4            # Wx + Wh + bias
    act = bt * (I * x.dtype.itemsize + H * h.dtype.itemsize + 3 * Hc * 4)
    vmem_limit = int(min(max(2 * (w_chunk + act) + (8 << 20), 32 << 20), 64 << 20))

    ht_pad, ct_pad = pl.pallas_call(
        _lstm_cell_kernel,
        out_shape=(jax.ShapeDtypeStruct((B, Hp), jnp.float32),
                   jax.ShapeDtypeStruct((B, Hp), jnp.float32)),
        grid=grid,
        in_specs=[
            pl.BlockSpec((bt, I), lambda i, j: (i, 0)),        # x tile
            pl.BlockSpec((bt, H), lambda i, j: (i, 0)),        # h tile
            pl.BlockSpec((bt, Hc), lambda i, j: (i, j)),       # prev c chunk
            pl.BlockSpec((I, 4 * Hc), lambda i, j: (0, j)),    # Wx chunk
            pl.BlockSpec((H, 4 * Hc), lambda i, j: (0, j)),    # Wh chunk
            pl.BlockSpec((1, 4 * Hc), lambda i, j: (0, j)),    # bias chunk
        ],
        out_specs=(pl.BlockSpec((bt, Hc), lambda i, j: (i, j)),
                   pl.BlockSpec((bt, Hc), lambda i, j: (i, j))),
        input_output_aliases={2: 1},   # in-place cell-state update
        compiler_params=pltpu.CompilerParams(
            dimension_semantics=("parallel", "parallel"),
            vmem_limit_bytes=vmem_limit),
    )(x, h, c_pad, wx, wh, b)

    if Hp != H:
        return ht_pad[:, :H], ct_pad[:, :H]
    return ht_pad, ct_pad


def reference_lstm_cell(x, state, params):
    """Pure-JAX f32 mirror of the PyTorch MyLSTMCell.forward."""
    ht_1, ct_1 = state
    lin = lambda a, w, b=None: a @ w.T + (0.0 if b is None else b)
    it = jax.nn.sigmoid(lin(x, params["w_i_xx"], params["b_i_xx"])
                        + lin(ht_1, params["w_i_hh"]))
    ft = jax.nn.sigmoid(lin(x, params["w_f_xx"], params["b_f_xx"])
                        + lin(ht_1, params["w_f_hh"]))
    ct_tilde = jnp.tanh(lin(x, params["w_c_xx"], params["b_c_xx"])
                        + lin(ht_1, params["w_c_hh"]))
    ct = ct_tilde * it + ct_1 * ft
    ot = jax.nn.sigmoid(lin(x, params["w_o_xx"], params["b_o_xx"])
                        + lin(ht_1, params["w_o_hh"]))
    ht = ot * jnp.tanh(ct)
    return ht, ct


if __name__ == "__main__":
    B, I, H = 8, 16, 32

    key = jax.random.PRNGKey(0)
    kx, kh, kc, kp = jax.random.split(key, 4)
    x = jax.random.normal(kx, (B, I), jnp.float32)
    h0 = jax.random.normal(kh, (B, H), jnp.float32)
    c0 = jax.random.normal(kc, (B, H), jnp.float32)

    # Deterministic parameters in PyTorch nn.Linear layout: weight (out, in),
    # bias (out,); the *_hh layers have no bias (matches the module).
    def linear_init(k, out_dim, in_dim, with_bias):
        kw, kb = jax.random.split(k)
        s = 1.0 / jnp.sqrt(jnp.float32(in_dim))
        w = jax.random.uniform(kw, (out_dim, in_dim), jnp.float32, -s, s)
        bb = (jax.random.uniform(kb, (out_dim,), jnp.float32, -s, s)
              if with_bias else None)
        return w, bb

    params = {}
    keys = list(jax.random.split(kp, 8))
    for g, k_xx, k_hh in zip("ifco", keys[0::2], keys[1::2]):
        w, bb = linear_init(k_xx, H, I, True)
        params[f"w_{g}_xx"], params[f"b_{g}_xx"] = w, bb
        w, _ = linear_init(k_hh, H, H, False)
        params[f"w_{g}_hh"] = w

    ht_ref, ct_ref = reference_lstm_cell(x, (h0, c0), params)

    # Default path: bf16 weights on the MXU (x/h cast in-kernel), f32 state.
    wx, wh, bias, hc = prepare_lstm_weights(params, jnp.bfloat16)
    ht, ct = lstm_cell(x, h0, c0, wx, wh, bias, gate_chunk=hc)
    jax.block_until_ready((ht, ct))
    assert ht.dtype == jnp.float32 and ct.dtype == jnp.float32
    assert jnp.allclose(ht, ht_ref, atol=5e-2, rtol=2e-2), "bf16 ht mismatch"
    assert jnp.allclose(ct, ct_ref, atol=5e-2, rtol=2e-2), "bf16 ct mismatch"

    # f32 path: tight numerical check of the fused-kernel structure.
    wx32, wh32, bias32, hc32 = prepare_lstm_weights(params, jnp.float32)
    ht32, ct32 = lstm_cell(x, h0, c0, wx32, wh32, bias32, gate_chunk=hc32)
    jax.block_until_ready((ht32, ct32))
    assert jnp.allclose(ht32, ht_ref, atol=1e-5, rtol=1e-5), "f32 ht mismatch"
    assert jnp.allclose(ct32, ct_ref, atol=1e-5, rtol=1e-5), "f32 ct mismatch"

    print("KERNEL_OK")
</pallas_src>

<mosaic_0001>
module attributes {stable_mosaic.version = 11 : i64} {
  func.func @_lstm_cell_kernel(%arg0: i32, %arg1: i32, %arg2: memref<8x16xf32, #tpu.memory_space<vmem>>, %arg3: memref<8x32xf32, #tpu.memory_space<vmem>>, %arg4: memref<8x128xf32, #tpu.memory_space<vmem>>, %arg5: memref<16x512xbf16, #tpu.memory_space<vmem>>, %arg6: memref<32x512xbf16, #tpu.memory_space<vmem>>, %arg7: memref<1x512xf32, #tpu.memory_space<vmem>>, %arg8: memref<8x128xf32, #tpu.memory_space<vmem>>, %arg9: memref<8x128xf32, #tpu.memory_space<vmem>>) attributes {dimension_semantics = [#tpu.dimension_semantics<parallel>, #tpu.dimension_semantics<parallel>], iteration_bounds = array<i64: 1, 1>, scalar_prefetch = 0 : i64, scratch_operands = 0 : i64, tpu.core_type = #tpu.core_type<tc>, window_params = [{transform_indices = @transform_0, window_bounds = array<i64: 8, 16>}, {transform_indices = @transform_1, window_bounds = array<i64: 8, 32>}, {transform_indices = @transform_2, window_bounds = array<i64: 8, 128>}, {transform_indices = @transform_3, window_bounds = array<i64: 16, 512>}, {transform_indices = @transform_4, window_bounds = array<i64: 32, 512>}, {transform_indices = @transform_5, window_bounds = array<i64: 1, 512>}, {transform_indices = @transform_6, window_bounds = array<i64: 8, 128>}, {transform_indices = @transform_7, window_bounds = array<i64: 8, 128>}]} {
    %c0 = arith.constant 0 : index
    %c0_0 = arith.constant 0 : index
    %0 = vector.load %arg2[%c0, %c0_0] : memref<8x16xf32, #tpu.memory_space<vmem>>, vector<8x16xf32>
    %1 = arith.truncf %0 : vector<8x16xf32> to vector<8x16xbf16>
    %c0_1 = arith.constant 0 : index
    %c0_2 = arith.constant 0 : index
    %2 = vector.load %arg5[%c0_1, %c0_2] : memref<16x512xbf16, #tpu.memory_space<vmem>>, vector<16x512xbf16>
    %cst = arith.constant dense<0.000000e+00> : vector<8x512xf32>
    %3 = tpu.matmul %1, %2, %cst {dimension_numbers = #tpu.dot_dimension_numbers<[1], [0], [0], [1], [0, 0, 1, 1], [], []>} : vector<8x16xbf16>, vector<16x512xbf16>, vector<8x512xf32> -> vector<8x512xf32>
    %c0_3 = arith.constant 0 : index
    %c0_4 = arith.constant 0 : index
    %4 = vector.load %arg3[%c0_3, %c0_4] : memref<8x32xf32, #tpu.memory_space<vmem>>, vector<8x32xf32>
    %5 = arith.truncf %4 : vector<8x32xf32> to vector<8x32xbf16>
    %c0_5 = arith.constant 0 : index
    %c0_6 = arith.constant 0 : index
    %6 = vector.load %arg6[%c0_5, %c0_6] : memref<32x512xbf16, #tpu.memory_space<vmem>>, vector<32x512xbf16>
    %cst_7 = arith.constant dense<0.000000e+00> : vector<8x512xf32>
    %7 = tpu.matmul %5, %6, %cst_7 {dimension_numbers = #tpu.dot_dimension_numbers<[1], [0], [0], [1], [0, 0, 1, 1], [], []>} : vector<8x32xbf16>, vector<32x512xbf16>, vector<8x512xf32> -> vector<8x512xf32>
    %8 = arith.addf %3, %7 : vector<8x512xf32>
    %c0_8 = arith.constant 0 : index
    %c0_9 = arith.constant 0 : index
    %9 = vector.load %arg7[%c0_8, %c0_9] : memref<1x512xf32, #tpu.memory_space<vmem>>, vector<1x512xf32>
    %10 = vector.broadcast %9 : vector<1x512xf32> to vector<8x512xf32>
    %11 = arith.addf %8, %10 : vector<8x512xf32>
    %12 = vector.extract_strided_slice %11 {offsets = [0, 0], sizes = [8, 128], strides = [1, 1]} : vector<8x512xf32> to vector<8x128xf32>
    %cst_10 = arith.constant 5.000000e-01 : f32
    %13 = vector.broadcast %cst_10 : f32 to vector<8x128xf32>
    %14 = arith.mulf %13, %12 : vector<8x128xf32>
    %15 = math.tanh %14 : vector<8x128xf32>
    %cst_11 = arith.constant 5.000000e-01 : f32
    %16 = vector.broadcast %cst_11 : f32 to vector<8x128xf32>
    %17 = arith.mulf %16, %15 : vector<8x128xf32>
    %cst_12 = arith.constant 5.000000e-01 : f32
    %18 = vector.broadcast %cst_12 : f32 to vector<8x128xf32>
    %19 = arith.addf %17, %18 : vector<8x128xf32>
    %20 = vector.extract_strided_slice %11 {offsets = [0, 128], sizes = [8, 128], strides = [1, 1]} : vector<8x512xf32> to vector<8x128xf32>
    %cst_13 = arith.constant 5.000000e-01 : f32
    %21 = vector.broadcast %cst_13 : f32 to vector<8x128xf32>
    %22 = arith.mulf %21, %20 : vector<8x128xf32>
    %23 = math.tanh %22 : vector<8x128xf32>
    %cst_14 = arith.constant 5.000000e-01 : f32
    %24 = vector.broadcast %cst_14 : f32 to vector<8x128xf32>
    %25 = arith.mulf %24, %23 : vector<8x128xf32>
    %cst_15 = arith.constant 5.000000e-01 : f32
    %26 = vector.broadcast %cst_15 : f32 to vector<8x128xf32>
    %27 = arith.addf %25, %26 : vector<8x128xf32>
    %28 = vector.extract_strided_slice %11 {offsets = [0, 256], sizes = [8, 128], strides = [1, 1]} : vector<8x512xf32> to vector<8x128xf32>
    %29 = math.tanh %28 : vector<8x128xf32>
    %30 = vector.extract_strided_slice %11 {offsets = [0, 384], sizes = [8, 128], strides = [1, 1]} : vector<8x512xf32> to vector<8x128xf32>
    %cst_16 = arith.constant 5.000000e-01 : f32
    %31 = vector.broadcast %cst_16 : f32 to vector<8x128xf32>
    %32 = arith.mulf %31, %30 : vector<8x128xf32>
    %33 = math.tanh %32 : vector<8x128xf32>
    %cst_17 = arith.constant 5.000000e-01 : f32
    %34 = vector.broadcast %cst_17 : f32 to vector<8x128xf32>
    %35 = arith.mulf %34, %33 : vector<8x128xf32>
    %cst_18 = arith.constant 5.000000e-01 : f32
    %36 = vector.broadcast %cst_18 : f32 to vector<8x128xf32>
    %37 = arith.addf %35, %36 : vector<8x128xf32>
    %38 = arith.mulf %29, %19 : vector<8x128xf32>
    %c0_19 = arith.constant 0 : index
    %c0_20 = arith.constant 0 : index
    %39 = vector.load %arg4[%c0_19, %c0_20] : memref<8x128xf32, #tpu.memory_space<vmem>>, vector<8x128xf32>
    %40 = arith.mulf %39, %27 : vector<8x128xf32>
    %41 = arith.addf %38, %40 : vector<8x128xf32>
    %42 = math.tanh %41 : vector<8x128xf32>
    %43 = arith.mulf %37, %42 : vector<8x128xf32>
    %c0_21 = arith.constant 0 : index
    %c0_22 = arith.constant 0 : index
    %44 = vector.load %arg8[%c0_21, %c0_22] : memref<8x128xf32, #tpu.memory_space<vmem>>, vector<8x128xf32>
    tpu.vector_store %arg8[%c0_21, %c0_22], %43 {strides = array<i32>} : memref<8x128xf32, #tpu.memory_space<vmem>>, vector<8x128xf32>,
    %c0_23 = arith.constant 0 : index
    %c0_24 = arith.constant 0 : index
    %45 = vector.load %arg9[%c0_23, %c0_24] : memref<8x128xf32, #tpu.memory_space<vmem>>, vector<8x128xf32>
    tpu.vector_store %arg9[%c0_23, %c0_24], %41 {strides = array<i32>} : memref<8x128xf32, #tpu.memory_space<vmem>>, vector<8x128xf32>,
    return
  }
  func.func @transform_0(%arg0: i32, %arg1: i32) -> (i32, i32) {
    %c0_i32 = arith.constant 0 : i32
    %c0_i32_0 = arith.constant 0 : i32
    return %arg0, %c0_i32 : i32, i32
  }
  func.func @transform_1(%arg0: i32, %arg1: i32) -> (i32, i32) {
    %c0_i32 = arith.constant 0 : i32
    %c0_i32_0 = arith.constant 0 : i32
    return %arg0, %c0_i32 : i32, i32
  }
  func.func @transform_2(%arg0: i32, %arg1: i32) -> (i32, i32) {
    %c0_i32 = arith.constant 0 : i32
    return %arg0, %arg1 : i32, i32
  }
  func.func @transform_3(%arg0: i32, %arg1: i32) -> (i32, i32) {
    %c0_i32 = arith.constant 0 : i32
    %c0_i32_0 = arith.constant 0 : i32
    return %c0_i32, %arg1 : i32, i32
  }
  func.func @transform_4(%arg0: i32, %arg1: i32) -> (i32, i32) {
    %c0_i32 = arith.constant 0 : i32
    %c0_i32_0 = arith.constant 0 : i32
    return %c0_i32, %arg1 : i32, i32
  }
  func.func @transform_5(%arg0: i32, %arg1: i32) -> (i32, i32) {
    %c0_i32 = arith.constant 0 : i32
    %c0_i32_0 = arith.constant 0 : i32
    return %c0_i32, %arg1 : i32, i32
  }
  func.func @transform_6(%arg0: i32, %arg1: i32) -> (i32, i32) {
    %c0_i32 = arith.constant 0 : i32
    return %arg0, %arg1 : i32, i32
  }
  func.func @transform_7(%arg0: i32, %arg1: i32) -> (i32, i32) {
    %c0_i32 = arith.constant 0 : i32
    return %arg0, %arg1 : i32, i32
  }
}

</mosaic_0001>

<bundles_post_ra>
// kernel: lstm_cell.1
= control target key start
LH: loop header
LB: loop body
LE: loop exit
PB: predicated region body
PF: predicated region fallthrough
CT: control target
= control target key end

     0   :  { %13 = vsyncpa [#allocation3], 0  ;;  %s589_s0 = inlined_call_operand.vmem [shape: f32[8,16], index: 0, kind: input, shape index: {}]   ;;  %s590_s1 = inlined_call_operand.vmem [shape: f32[8,32], index: 1, kind: input, shape index: {}]   ;;  %s591_s2 = inlined_call_operand.vmem [shape: f32[8,128], index: 2, kind: input, shape index: {}, may-alias: {2,7}]   ;;  %s592_s3 = inlined_call_operand.hbm [shape: bf16[16,512], index: 3, kind: input, shape index: {}]   ;;  %s593_s4 = inlined_call_operand.hbm [shape: bf16[32,512], index: 4, kind: input, shape index: {}]   ;;  %s594_s5 = inlined_call_operand.vmem [shape: f32[1,512], index: 5, kind: input, shape index: {}]   ;;  %s595_s6 = inlined_call_operand.hbm [shape: f32[8,128], index: 6, kind: output, shape index: {0}]   ;;  %s596_s7 = inlined_call_operand.vmem [shape: f32[8,128], index: 7, kind: output, shape index: {1}, may-alias: {2,7}]  }
   0x1   :  { %14 = vsyncpa [#allocation6], 0 }
   0x2   :  { %15 = vsyncpa [#allocation4], 0  ;;  %s492_s24 = smov [#allocation2]   ;;  %s420_s28 = scalar_lea.hbm %s592_s3, 512 }
   0x3   :  { %s27_s25 = sshll.u32 %s492_s24, 4  ;;  %p421_p0 = scmp.ne.s32.totalorder %s592_s3, %s420_s28  ;;  %s28_s25 = int_to_ptr.vmem [resolvable:$true] %s27_s25 }
   0x4   :  { %p424_p1 = scmp.lt.u32.totalorder %s420_s28, %s592_s3 }
   0x6   :  { %p426_p2 = pnand %p424_p1, %p421_p0 }
   0x8   :  { %429 = shalt.err (!%p426_p2)
}
   0x9   :  { %s430_s10 = scalar_lea.vmem %s28_s25, 512  ;;  %p435_p4 = scmp.lt.s32.totalorder %s28_s25, %s28_s25 }
   0xa   :  { %p431_p3 = scmp.ne.s32.totalorder %s28_s25, %s430_s10  ;;  %p436_p5 = scmp.lt.s32.totalorder %s430_s10, %s430_s10 }
   0xc   :  { %p437_p6 = por %p436_p5, %p435_p4 }
   0xe   :  { %p438_p7 = pnand %p437_p6, %p431_p3 }
  0x10   :  { %441 = shalt.err (!%p438_p7)
}
  0x11   :  { %s493_s11 = smov 256   ;;  %s494_s12 = smov 16  }
  0x12   :  { %33 = dma.hbm_to_vmem [thread:$0]  %s592_s3, 512, %s28_s25, [#allocation3], %s493_s11, %s493_s11, %s494_s12  }
  0x13   :  { %s495_s15 = smov [#allocation5]   ;;  %s442_s19 = scalar_lea.hbm %s593_s4, 1024 }
  0x14   :  { %s39_s16 = sshll.u32 %s495_s15, 4  ;;  %p443_p8 = scmp.ne.s32.totalorder %s593_s4, %s442_s19  ;;  %s40_s16 = int_to_ptr.vmem [resolvable:$true] %s39_s16 }
  0x15   :  { %p446_p9 = scmp.lt.u32.totalorder %s442_s19, %s593_s4 }
  0x17   :  { %p448_p10 = pnand %p446_p9, %p443_p8 }
  0x19   :  { %451 = shalt.err (!%p448_p10)
}
  0x1a   :  { %s452_s24 = scalar_lea.vmem %s40_s16, 1024  ;;  %p457_p12 = scmp.lt.s32.totalorder %s40_s16, %s40_s16 }
  0x1b   :  { %p453_p11 = scmp.ne.s32.totalorder %s40_s16, %s452_s24  ;;  %p458_p13 = scmp.lt.s32.totalorder %s452_s24, %s452_s24 }
  0x1d   :  { %p459_p0 = por %p458_p13, %p457_p12 }
  0x1f   :  { %p460_p1 = pnand %p459_p0, %p453_p11 }
  0x21   :  { %463 = shalt.err (!%p460_p1)
}
  0x22   :  { %45 = dma.hbm_to_vmem [thread:$0]  %s593_s4, 1024, %s40_s16, [#allocation6], %s493_s11, %s493_s11, %s494_s12  }
  0x23   :  { %486 = dma.done.wait [#allocation3], 512  }
  0x24   :  { %487 = vsyncadd [#allocation3], 4294966784 }
  0x25   :  { %488 = dma.done.wait [#allocation6], 1024  }
  0x26   :  { %489 = vsyncadd [#allocation6], 4294966272  ;;  %v496_v0 = vmov 0   ;;  %v392_v1 = vld [vmem:[#allocation5 + $0x4] ss:$16 sps:$4 sm:$0xff]   ;;  %vm111_vm0 = vcmask 261120   ;;  %v305_v17 = vlaneseq }
  0x27   :  { %147 = vmatprep.mubr.bf16.mxu0 %v496_v0  ;;  %188 = vmatprep.mubr.bf16.mxu1 %v496_v0  ;;  %v394_v2 = vld [vmem:[#allocation5 + $0xc] ss:$16 sps:$4 sm:$0xff]   ;;  %v396_v3 = vld [vmem:[#allocation5] ss:$16 sps:$4 sm:$0xff]   ;;  %v397_v4 = vld [vmem:[#allocation5 + $0x8] ss:$16 sps:$4 sm:$0xff]  }
  0x28   :  { %115 = vmatprep.subr.bf16.mxu0 %v392_v1  ;;  %156 = vmatprep.subr.bf16.mxu1 %v394_v2  ;;  %v398_v5 = vld [vmem:[#allocation5 + $0x24] ss:$16 sps:$4 sm:$0xff]   ;;  %v400_v6 = vld [vmem:[#allocation5 + $0x2c] ss:$16 sps:$4 sm:$0xff]   ;;  %v402_v7 = vld [vmem:[#allocation5 + $0x20] ss:$16 sps:$4 sm:$0xff]  }
  0x29   :  { %116 = vmatpush1.bf16.msra.mxu0 %v396_v3  ;;  %157 = vmatpush1.bf16.msra.mxu1 %v397_v4  ;;  %v403_v8 = vld [vmem:[#allocation5 + $0x28] ss:$16 sps:$4 sm:$0xff]   ;;  %v61_v9 = vld [vmem:[%s590_s1] sm:$0xff]  ;;  %v409_v14 = vld [vmem:[#allocation2 + $0xc] ss:$16 sps:$4 sm:$0xff]   ;;  %vm217_vm1 = vcmask 130048  }
  0x2a   :  { %117 = vmatprep.subr.bf16.mxu0 %v398_v5  ;;  %158 = vmatprep.subr.bf16.mxu1 %v400_v6  ;;  %v406_v10 = vld [vmem:[#allocation2 + $0x4] ss:$16 sps:$4 sm:$0xff]   ;;  %v62_v11 = vpack.c.bf16 %v61_v9, %v61_v9  ;;  %v404_v12 = vld [vmem:[#allocation2] ss:$16 sps:$4 sm:$0xff]   ;;  %v407_v13 = vld [vmem:[#allocation2 + $0x8] ss:$16 sps:$4 sm:$0xff]  }
  0x2b   :  { %v55_v15 = vld [vmem:[%s589_s0] sm:$0xff]  ;;  %v306_v18 = vshrl.u32 %v305_v17, 7  ;;  %s497_s9 = smov [#allocation7]  }
  0x2c   :  { %v56_v16 = vpack.c.bf16 %v55_v15, %v55_v15  ;;  %v303_v28 = vld [vmem:[%s594_s5] sm:$0xf]  ;;  %s356_s10 = sshll.u32 %s497_s9, 4  ;;  %s357_s10 = int_to_ptr.vmem [resolvable:$true] %s356_s10 }
  0x2d   :  { %118 = vmatpush1.bf16.msra.mxu0 %v402_v7  ;;  %159 = vmatpush1.bf16.msra.mxu1 %v403_v8  ;;  %v307_v27 = vsub.s32 0, %v306_v18  ;;  %v311_v29 = vsub.s32 1, %v306_v18  ;;  %v315_v31 = vsub.s32 2, %v306_v18  ;;  %v319_v45 = vsub.s32 3, %v306_v18  ;;  %v343_v60 = vld [vmem:[%s591_s2] sm:$0xff]  ;;  %s464_s2 = scalar_lea.vmem %s357_s10, 128  ;;  %p469_p3 = scmp.lt.s32.totalorder %s357_s10, %s357_s10 }
  0x2e   :  { %221 = vmatprep.subr.bf16.mxu0 %v406_v10  ;;  %262 = vmatprep.subr.bf16.mxu1 %v409_v14  ;;  %p465_p2 = scmp.ne.s32.totalorder %s357_s10, %s464_s2  ;;  %p470_p4 = scmp.lt.s32.totalorder %s464_s2, %s464_s2 }
  0x2f   :  { %v308_v30 = vrot.slane %v303_v28, %v307_v27  ;;  %v312_v34 = vrot.slane %v303_v28, %v311_v29  ;;  %v316_v44 = vrot.slane %v303_v28, %v315_v31  ;;  %v320_v52 = vrot.slane %v303_v28, %v319_v45 }
  0x30   :  { %378 = vmatmul.mubr.msk.bf16.vlgmr.msra.gmra.mrb[0].mxu0 %vm111_vm0, %v62_v11  ;;  %379 = vmatmul.mubr.msk.bf16.vlgmr.msra.gmra.mrb[0].mxu1 %vm111_vm0, %v62_v11  ;;  %p471_p5 = por %p470_p4, %p469_p3 }
  0x31   :  { %222 = vmatpush1.bf16.msra.mxu0 %v404_v12  ;;  %263 = vmatpush1.bf16.msra.mxu1 %v407_v13 }
  0x32   :  { %253 = vmatprep.mubr.bf16.mxu0 %v496_v0  ;;  %294 = vmatprep.mubr.bf16.mxu1 %v496_v0  ;;  %p472_p6 = pnand %p471_p5, %p465_p2 }
  0x38   :  { %384 = vmatmul.mubr.msk.bf16.vlgmr.msra.gmra.mrb[4].mxu0 %vm217_vm1, %v56_v16  ;;  %385 = vmatmul.mubr.msk.bf16.vlgmr.msra.gmra.mrb[4].mxu1 %vm217_vm1, %v56_v16 }
 0x103   :  { %v149_v19 = vpop.f32.mrb[0].mxu0  ;;  %v190_v20 = vpop.f32.mrb[0].mxu1 }
 0x104   :  { %v151_v21 = vpop.f32.mrb[1].mxu0  ;;  %v192_v22 = vpop.f32.mrb[1].mxu1 }
 0x105   :  { %v153_v23 = vpop.f32.mrb[2].mxu0  ;;  %v194_v24 = vpop.f32.mrb[2].mxu1 }
 0x106   :  { %v154_v25 = vpop.f32.mrb[3].mxu0  ;;  %v195_v26 = vpop.f32.mrb[3].mxu1 }
 0x10b   :  { %v255_v32 = vpop.f32.mrb[4].mxu0  ;;  %v296_v33 = vpop.f32.mrb[4].mxu1 }
 0x10c   :  { %v256_v35 = vadd.f32 %v255_v32, %v149_v19  ;;  %v297_v36 = vadd.f32 %v296_v33, %v190_v20  ;;  %v257_v37 = vpop.f32.mrb[5].mxu0  ;;  %v298_v38 = vpop.f32.mrb[5].mxu1 }
 0x10d   :  { %v258_v39 = vadd.f32 %v257_v37, %v151_v21  ;;  %v299_v40 = vadd.f32 %v298_v38, %v192_v22  ;;  %v259_v41 = vpop.f32.mrb[6].mxu0  ;;  %v300_v42 = vpop.f32.mrb[6].mxu1 }
 0x10e   :  { %v325_v43 = vadd.f32 %v308_v30, %v256_v35  ;;  %v260_v46 = vpop.f32.mrb[7].mxu0  ;;  %v301_v47 = vpop.f32.mrb[7].mxu1  ;;  %v327_v51 = vadd.f32 %v316_v44, %v297_v36 }
 0x10f   :  { %v326_v48 = vadd.f32 %v312_v34, %v258_v39  ;;  %v328_v53 = vadd.f32 %v320_v52, %v299_v40 }
 0x110   :  { %v329_v49 = vmul.f32 0.5, %v325_v43 }
 0x111   :  { %v333_v50 = vmul.f32 0.5, %v326_v48  ;;  %v338_v54 = vmul.f32 0.5, %v328_v53 }
 0x112   :  { %410 = vtanh.f32 %v329_v49 }
 0x113   :  { %412 = vtanh.f32 %v333_v50 }
 0x114   :  { %414 = vtanh.f32 %v327_v51 }
 0x115   :  { %416 = vtanh.f32 %v338_v54 }
 0x11c   :  { %v411_v55 = vpop.eup %410 }
 0x11d   :  { %v413_v56 = vpop.eup %412  ;;  %v331_v57 = vmul.f32 0.5, %v411_v55 }
 0x11e   :  { %v335_v58 = vmul.f32 0.5, %v413_v56  ;;  %v415_v61 = vpop.eup %414 }
 0x11f   :  { %v332_v59 = vadd.f32 0.5, %v331_v57  ;;  %v417_v2 = vpop.eup %416 }
 0x120   :  { %v336_v62 = vadd.f32 0.5, %v335_v58  ;;  %v340_v3 = vmul.f32 0.5, %v417_v2 }
 0x121   :  { %v342_v63 = vmul.f32 %v415_v61, %v332_v59 }
 0x122   :  { %v344_v0 = vmul.f32 %v343_v60, %v336_v62  ;;  %v341_v4 = vadd.f32 0.5, %v340_v3 }
 0x124   :  { %v345_v1 = vadd.f32 %v344_v0, %v342_v63 }
 0x126   :  { %418 = vtanh.f32 %v345_v1  ;;  %349 = vst [vmem:[%s596_s7] sm:$0xff] %v345_v1 }
 0x130   :  { %v419_v5 = vpop.eup %418 }
 0x131   :  { %v347_v6 = vmul.f32 %v419_v5, %v341_v4 }
 0x133   :  { %348 = vst [vmem:[#allocation7] sm:$0xff] %v347_v6 }
 0x134   :  { %475 = shalt.err (!%p472_p6)
}
 0x135   :  { %s476_s7 = scalar_lea.hbm %s595_s6, 128 }
 0x136   :  { %p477_p7 = scmp.ne.s32.totalorder %s595_s6, %s476_s7  ;;  %p480_p8 = scmp.lt.u32.totalorder %s476_s7, %s595_s6 }
 0x138   :  { %p482_p9 = pnand %p480_p8, %p477_p7 }
 0x13a   :  { %485 = shalt.err (!%p482_p9)
}
 0x13b   :  { %359 = dma.vmem_to_hbm [thread:$0]  %s357_s10, 128, %s595_s6, [#allocation4]  }
 0x13c   :  { %490 = dma.done.wait [#allocation4], 128  }
 0x13d   :  { %491 = vsyncadd [#allocation4], 4294967168 }
 0x13e   :  { %367 = vsyncpa [#allocation3], 1 }
 0x13f   :  { %368 = vsyncpa [#allocation6], 1 }
 0x140   :  { %369 = vsyncpa [#allocation4], 1 }

</bundles_post_ra>
